<compile_context>
chip_gen: v7x
topology: tpu7x:2x2x1
jax: 0.10.0
libtpu: 0.0.40
codegen_flags: <defaults>
</compile_context>

<pallas_src>
import numpy as np
import jax
import jax.numpy as jnp
from jax.experimental import pallas as pl
from jax.experimental.pallas import tpu as pltpu


def _round_up(x, m):
    return ((x + m - 1) // m) * m


# ----------------------------- config (dvector defaults) --------------------
SAMPLE_RATE = 16000
FFT_WINDOW_MS = 25.0
FFT_HOP_MS = 10.0
F_MIN = 50.0
N_MELS = 40

N_FFT = int(SAMPLE_RATE * FFT_WINDOW_MS / 1000)     # 400
HOP = int(SAMPLE_RATE * FFT_HOP_MS / 1000)          # 160
N_FREQ = N_FFT // 2 + 1                             # 201 (onesided)
F_MAX = float(SAMPLE_RATE // 2)

NWIN = -(-N_FFT // HOP)                             # 3 hop-aligned window row-blocks
N_EXT = NWIN * HOP                                  # 480 (window zero-padded, exact)
N2 = _round_up(2 * N_FREQ, 128)                     # 512  (cos | sin packed + zero pad)
MP = _round_up(N_MELS, 128)                         # 128
MAX_TILE_T = 256                                    # frames per grid step


# ----------------------------- deterministic parameter construction ---------
def hann_window_periodic(n):
    k = np.arange(n)
    return 0.5 - 0.5 * np.cos(2.0 * np.pi * k / n)


def melscale_fbanks(n_freqs, f_min, f_max, n_mels, sample_rate):
    """torchaudio.functional.melscale_fbanks, htk mel scale, norm=None."""
    all_freqs = np.linspace(0.0, sample_rate // 2, n_freqs)

    def hz_to_mel(f):
        return 2595.0 * np.log10(1.0 + f / 700.0)

    def mel_to_hz(m):
        return 700.0 * (10.0 ** (m / 2595.0) - 1.0)

    m_pts = np.linspace(hz_to_mel(f_min), hz_to_mel(f_max), n_mels + 2)
    f_pts = mel_to_hz(m_pts)
    f_diff = f_pts[1:] - f_pts[:-1]
    slopes = f_pts[None, :] - all_freqs[:, None]
    down = (-1.0 * slopes[:, :-2]) / f_diff[:-1]
    up = slopes[:, 2:] / f_diff[1:]
    fb = np.maximum(0.0, np.minimum(down, up))
    return fb.astype(np.float32)                     # (n_freqs, n_mels)


def build_weights():
    """Packed bf16 kernel weights + f32 matrices for the reference."""
    win = hann_window_periodic(N_FFT)
    n = np.arange(N_FFT)[:, None]
    k = np.arange(N_FREQ)[None, :]
    ang = 2.0 * np.pi * n * k / N_FFT
    cos_m = (win[:, None] * np.cos(ang)).astype(np.float32)   # (400, 201)
    sin_m = (win[:, None] * np.sin(ang)).astype(np.float32)

    # W_full[n, :] = window-weighted [cos | sin] at sample position n of the frame;
    # rows n >= N_FFT are zero (exact: they only multiply hop-padding samples).
    w_full = np.zeros((N_EXT, N2), np.float32)
    w_full[:N_FFT, :N_FREQ] = cos_m
    w_full[:N_FFT, N_FREQ:2 * N_FREQ] = sin_m
    w = w_full.reshape(NWIN, HOP, N2)                          # (3, 160, 512)

    fb = melscale_fbanks(N_FREQ, F_MIN, F_MAX, N_MELS, SAMPLE_RATE)   # (201, 40)
    fb2 = np.zeros((N2, MP), np.float32)
    fb2[:N_FREQ, :N_MELS] = fb                                 # re^2 part
    fb2[N_FREQ:2 * N_FREQ, :N_MELS] = fb                       # im^2 part

    return (jnp.asarray(w).astype(jnp.bfloat16),
            jnp.asarray(fb2).astype(jnp.bfloat16),
            jnp.asarray(cos_m), jnp.asarray(sin_m), jnp.asarray(fb))


# ----------------------------- Pallas kernel --------------------------------
def logmel_kernel(chunks_ref, w_ref, fb2_ref, out_ref):
    # chunks_ref: (1, TILE_T + NWIN - 1, HOP) f32  -- hop-aligned waveform rows
    # w_ref:      (NWIN, HOP, N2)  bf16            -- resident windowed-DFT weights
    # fb2_ref:    (N2, MP)         bf16            -- resident duplicated mel fbank
    # out_ref:    (TILE_T, MP)     f32
    tile_t = out_ref.shape[0]

    acc = jnp.zeros((tile_t, N2), jnp.float32)
    for j in range(NWIN):                                     # static, unrolled
        cj = chunks_ref[0, j:j + tile_t, :].astype(jnp.bfloat16)   # (TILE_T, HOP)
        acc = acc + jnp.dot(cj, w_ref[j], preferred_element_type=jnp.float32)

    power = acc * acc                                         # re^2 and im^2 columns
    mel = jnp.dot(power.astype(jnp.bfloat16), fb2_ref[...],
                  preferred_element_type=jnp.float32)         # (TILE_T, MP)
    out_ref[...] = jnp.log(jnp.maximum(mel, 1e-9))


# ----------------------------- wrapper ---------------------------------------
def log_melspectrogram(wav, w_bf16, fb2_bf16):
    """wav: (1, num_samples) float32 -> (num_frames, n_mels) float32."""
    x = wav[0]                                                # squeeze channel
    num_samples = x.shape[0]
    pad = N_FFT // 2
    assert num_samples > pad, "reflect padding requires num_samples > n_fft // 2"

    # torch.stft(center=True, pad_mode="reflect")
    xp = jnp.pad(x, (pad, pad), mode="reflect")               # len = num_samples + n_fft
    n_frames = 1 + num_samples // HOP

    tile_t = min(MAX_TILE_T, _round_up(n_frames, 8))
    num_tiles = pl.cdiv(n_frames, tile_t)
    t_pad = num_tiles * tile_t
    chunk_rows = tile_t + NWIN - 1

    # Reshape the waveform into HOP-wide rows; frame t = rows t, t+1, t+2 (the tail of
    # row t+2 multiplies zero weight rows of W, so this is exact). Zero-pad the tail.
    rows_total = max(t_pad + NWIN - 1, pl.cdiv(xp.shape[0], HOP))
    xp = jnp.pad(xp, (0, rows_total * HOP - xp.shape[0]))
    xp2d = xp.reshape(rows_total, HOP)

    # Per-tile row windows (overlap of only NWIN-1 rows per tile, ~1.01x duplication).
    chunks = jnp.stack(
        [jax.lax.slice_in_dim(xp2d, i * tile_t, i * tile_t + chunk_rows, axis=0)
         for i in range(num_tiles)], axis=0)                  # (num_tiles, chunk_rows, HOP)

    out = pl.pallas_call(
        logmel_kernel,
        out_shape=jax.ShapeDtypeStruct((t_pad, MP), jnp.float32),
        grid=(num_tiles,),
        in_specs=[
            pl.BlockSpec((1, chunk_rows, HOP), lambda i: (i, 0, 0)),   # per-tile waveform
            pl.BlockSpec((NWIN, HOP, N2), lambda i: (0, 0, 0)),        # resident DFT weights
            pl.BlockSpec((N2, MP), lambda i: (0, 0)),                  # resident mel fbank
        ],
        out_specs=pl.BlockSpec((tile_t, MP), lambda i: (i, 0)),
        compiler_params=pltpu.CompilerParams(
            dimension_semantics=("parallel",)),
    )(chunks, w_bf16, fb2_bf16)

    return out[:n_frames, :N_MELS]                            # (time, n_mels)


# ----------------------------- reference (plain JAX, f32) --------------------
def log_melspectrogram_ref(wav, cos_m, sin_m, fb):
    x = wav[0]
    pad = N_FFT // 2
    xp = jnp.pad(x, (pad, pad), mode="reflect")
    n_frames = 1 + x.shape[0] // HOP
    idx = np.arange(n_frames)[:, None] * HOP + np.arange(N_FFT)[None, :]
    frames = xp[idx]
    power = (frames @ cos_m) ** 2 + (frames @ sin_m) ** 2
    mel = power @ fb
    return jnp.log(jnp.maximum(mel, 1e-9))


if __name__ == "__main__":
    key = jax.random.PRNGKey(0)
    num_samples = 1600                                        # 0.1 s @ 16 kHz -> 11 frames
    wav = jax.random.normal(key, (1, num_samples), dtype=jnp.float32)

    w_bf16, fb2_bf16, cos_m, sin_m, fb = build_weights()

    out = jax.block_until_ready(log_melspectrogram(wav, w_bf16, fb2_bf16))
    ref = jax.block_until_ready(log_melspectrogram_ref(wav, cos_m, sin_m, fb))

    assert out.shape == (1 + num_samples // HOP, N_MELS), out.shape
    # bf16 MXU inputs (f32 accumulation) -> relaxed tolerance vs. the pure-f32 reference.
    np.testing.assert_allclose(np.asarray(out), np.asarray(ref), rtol=5e-2, atol=1e-1)

    print("KERNEL_OK")
</pallas_src>

<mosaic_0001>
module attributes {stable_mosaic.version = 11 : i64} {
  func.func @logmel_kernel(%arg0: i32, %arg1: memref<1x18x160xf32, #tpu.memory_space<vmem>>, %arg2: memref<3x160x512xbf16, #tpu.memory_space<vmem>>, %arg3: memref<512x128xbf16, #tpu.memory_space<vmem>>, %arg4: memref<16x128xf32, #tpu.memory_space<vmem>>) attributes {dimension_semantics = [#tpu.dimension_semantics<parallel>], iteration_bounds = array<i64: 1>, scalar_prefetch = 0 : i64, scratch_operands = 0 : i64, tpu.core_type = #tpu.core_type<tc>, window_params = [{transform_indices = @transform_0, window_bounds = array<i64: 1, 18, 160>}, {pipeline_mode = #tpu.pipeline_mode<synchronous>, transform_indices = @transform_1, window_bounds = array<i64: 3, 160, 512>}, {pipeline_mode = #tpu.pipeline_mode<synchronous>, transform_indices = @transform_2, window_bounds = array<i64: 512, 128>}, {transform_indices = @transform_3, window_bounds = array<i64: 16, 128>}]} {
    %cst = arith.constant 0.000000e+00 : f32
    %0 = vector.broadcast %cst : f32 to vector<16x512xf32>
    %c0 = arith.constant 0 : index
    %c0_0 = arith.constant 0 : index
    %c0_1 = arith.constant 0 : index
    %1 = vector.load %arg1[%c0, %c0_0, %c0_1] : memref<1x18x160xf32, #tpu.memory_space<vmem>>, vector<1x16x160xf32>
    %2 = vector.shape_cast %1 : vector<1x16x160xf32> to vector<16x160xf32>
    %3 = arith.truncf %2 : vector<16x160xf32> to vector<16x160xbf16>
    %c0_2 = arith.constant 0 : index
    %c0_3 = arith.constant 0 : index
    %c0_4 = arith.constant 0 : index
    %4 = vector.load %arg2[%c0_2, %c0_3, %c0_4] : memref<3x160x512xbf16, #tpu.memory_space<vmem>>, vector<1x160x512xbf16>
    %5 = vector.shape_cast %4 : vector<1x160x512xbf16> to vector<160x512xbf16>
    %cst_5 = arith.constant dense<0.000000e+00> : vector<16x512xf32>
    %6 = tpu.matmul %3, %5, %cst_5 {dimension_numbers = #tpu.dot_dimension_numbers<[1], [0], [0], [1], [0, 0, 1, 1], [], []>} : vector<16x160xbf16>, vector<160x512xbf16>, vector<16x512xf32> -> vector<16x512xf32>
    %7 = arith.addf %0, %6 : vector<16x512xf32>
    %c0_6 = arith.constant 0 : index
    %c1 = arith.constant 1 : index
    %c0_7 = arith.constant 0 : index
    %8 = vector.load %arg1[%c0_6, %c1, %c0_7] : memref<1x18x160xf32, #tpu.memory_space<vmem>>, vector<1x16x160xf32>
    %9 = vector.shape_cast %8 : vector<1x16x160xf32> to vector<16x160xf32>
    %10 = arith.truncf %9 : vector<16x160xf32> to vector<16x160xbf16>
    %c1_8 = arith.constant 1 : index
    %c0_9 = arith.constant 0 : index
    %c0_10 = arith.constant 0 : index
    %11 = vector.load %arg2[%c1_8, %c0_9, %c0_10] : memref<3x160x512xbf16, #tpu.memory_space<vmem>>, vector<1x160x512xbf16>
    %12 = vector.shape_cast %11 : vector<1x160x512xbf16> to vector<160x512xbf16>
    %cst_11 = arith.constant dense<0.000000e+00> : vector<16x512xf32>
    %13 = tpu.matmul %10, %12, %cst_11 {dimension_numbers = #tpu.dot_dimension_numbers<[1], [0], [0], [1], [0, 0, 1, 1], [], []>} : vector<16x160xbf16>, vector<160x512xbf16>, vector<16x512xf32> -> vector<16x512xf32>
    %14 = arith.addf %7, %13 : vector<16x512xf32>
    %c0_12 = arith.constant 0 : index
    %c2 = arith.constant 2 : index
    %c0_13 = arith.constant 0 : index
    %15 = vector.load %arg1[%c0_12, %c2, %c0_13] : memref<1x18x160xf32, #tpu.memory_space<vmem>>, vector<1x16x160xf32>
    %16 = vector.shape_cast %15 : vector<1x16x160xf32> to vector<16x160xf32>
    %17 = arith.truncf %16 : vector<16x160xf32> to vector<16x160xbf16>
    %c2_14 = arith.constant 2 : index
    %c0_15 = arith.constant 0 : index
    %c0_16 = arith.constant 0 : index
    %18 = vector.load %arg2[%c2_14, %c0_15, %c0_16] : memref<3x160x512xbf16, #tpu.memory_space<vmem>>, vector<1x160x512xbf16>
    %19 = vector.shape_cast %18 : vector<1x160x512xbf16> to vector<160x512xbf16>
    %cst_17 = arith.constant dense<0.000000e+00> : vector<16x512xf32>
    %20 = tpu.matmul %17, %19, %cst_17 {dimension_numbers = #tpu.dot_dimension_numbers<[1], [0], [0], [1], [0, 0, 1, 1], [], []>} : vector<16x160xbf16>, vector<160x512xbf16>, vector<16x512xf32> -> vector<16x512xf32>
    %21 = arith.addf %14, %20 : vector<16x512xf32>
    %22 = arith.mulf %21, %21 : vector<16x512xf32>
    %23 = arith.truncf %22 : vector<16x512xf32> to vector<16x512xbf16>
    %c0_18 = arith.constant 0 : index
    %c0_19 = arith.constant 0 : index
    %24 = vector.load %arg3[%c0_18, %c0_19] : memref<512x128xbf16, #tpu.memory_space<vmem>>, vector<512x128xbf16>
    %cst_20 = arith.constant dense<0.000000e+00> : vector<16x128xf32>
    %25 = tpu.matmul %23, %24, %cst_20 {dimension_numbers = #tpu.dot_dimension_numbers<[1], [0], [0], [1], [0, 0, 1, 1], [], []>} : vector<16x512xbf16>, vector<512x128xbf16>, vector<16x128xf32> -> vector<16x128xf32>
    %cst_21 = arith.constant 9.99999971E-10 : f32
    %26 = vector.broadcast %cst_21 : f32 to vector<16x128xf32>
    %27 = arith.maximumf %25, %26 : vector<16x128xf32>
    %28 = math.log %27 : vector<16x128xf32>
    %c0_22 = arith.constant 0 : index
    %c0_23 = arith.constant 0 : index
    %29 = vector.load %arg4[%c0_22, %c0_23] : memref<16x128xf32, #tpu.memory_space<vmem>>, vector<16x128xf32>
    tpu.vector_store %arg4[%c0_22, %c0_23], %28 {strides = array<i32>} : memref<16x128xf32, #tpu.memory_space<vmem>>, vector<16x128xf32>,
    return
  }
  func.func @transform_0(%arg0: i32) -> (i32, i32, i32) {
    %c0_i32 = arith.constant 0 : i32
    %c0_i32_0 = arith.constant 0 : i32
    %c0_i32_1 = arith.constant 0 : i32
    return %arg0, %c0_i32, %c0_i32_0 : i32, i32, i32
  }
  func.func @transform_1(%arg0: i32) -> (i32, i32, i32) {
    %c0_i32 = arith.constant 0 : i32
    %c0_i32_0 = arith.constant 0 : i32
    %c0_i32_1 = arith.constant 0 : i32
    %c0_i32_2 = arith.constant 0 : i32
    return %c0_i32, %c0_i32_0, %c0_i32_1 : i32, i32, i32
  }
  func.func @transform_2(%arg0: i32) -> (i32, i32) {
    %c0_i32 = arith.constant 0 : i32
    %c0_i32_0 = arith.constant 0 : i32
    %c0_i32_1 = arith.constant 0 : i32
    return %c0_i32, %c0_i32_0 : i32, i32
  }
  func.func @transform_3(%arg0: i32) -> (i32, i32) {
    %c0_i32 = arith.constant 0 : i32
    %c0_i32_0 = arith.constant 0 : i32
    return %arg0, %c0_i32 : i32, i32
  }
}

</mosaic_0001>

<bundles_post_ra>
// kernel: tpu_custom_call.1
= control target key start
LH: loop header
LB: loop body
LE: loop exit
PB: predicated region body
PF: predicated region fallthrough
CT: control target
= control target key end

     0   :  { %8 = vsyncpa [#allocation3], 0  ;;  %s2114_s0 = inlined_call_operand.vmem [shape: f32[1,18,160], index: 0, kind: input, shape index: {}]   ;;  %s2115_s1 = inlined_call_operand.hbm [shape: bf16[3,160,512], index: 1, kind: input, shape index: {}]   ;;  %s2116_s2 = inlined_call_operand.hbm [shape: bf16[512,128], index: 2, kind: input, shape index: {}]   ;;  %s2117_s3 = inlined_call_operand.hbm [shape: f32[16,128], index: 3, kind: output, shape index: {}]  }
   0x1   :  { %9 = vsyncpa [#allocation6], 0 }
   0x2   :  { %10 = vsyncpa [#allocation4], 0  ;;  %s1993_s12 = smov [#allocation2]   ;;  %s1921_s16 = scalar_lea.hbm %s2115_s1, 15360 }
   0x3   :  { %s18_s13 = sshll.u32 %s1993_s12, 4  ;;  %p1922_p0 = scmp.ne.s32.totalorder %s2115_s1, %s1921_s16  ;;  %s19_s13 = int_to_ptr.vmem [resolvable:$true] %s18_s13 }
   0x4   :  { %p1925_p1 = scmp.lt.u32.totalorder %s1921_s16, %s2115_s1 }
   0x6   :  { %p1927_p2 = pnand %p1925_p1, %p1922_p0 }
   0x8   :  { %1930 = shalt.err (!%p1927_p2)
}
   0x9   :  { %s1931_s21 = scalar_lea.vmem %s19_s13, 15360  ;;  %p1936_p4 = scmp.lt.s32.totalorder %s19_s13, %s19_s13 }
   0xa   :  { %p1932_p3 = scmp.ne.s32.totalorder %s19_s13, %s1931_s21  ;;  %p1937_p5 = scmp.lt.s32.totalorder %s1931_s21, %s1931_s21 }
   0xc   :  { %p1938_p6 = por %p1937_p5, %p1936_p4 }
   0xe   :  { %p1939_p7 = pnand %p1938_p6, %p1932_p3 }
  0x10   :  { %1942 = shalt.err (!%p1939_p7)
}
  0x11   :  { %s1994_s22 = smov 256   ;;  %s1995_s23 = smov 16  }
  0x12   :  { %24 = dma.hbm_to_vmem [thread:$0]  %s2115_s1, 15360, %s19_s13, [#allocation3], %s1994_s22, %s1994_s22, %s1995_s23  }
  0x13   :  { %s1996_s26 = smov [#allocation5]   ;;  %s1943_s30 = scalar_lea.hbm %s2116_s2, 4096 }
  0x14   :  { %s30_s27 = sshll.u32 %s1996_s26, 4  ;;  %p1944_p8 = scmp.ne.s32.totalorder %s2116_s2, %s1943_s30  ;;  %s31_s27 = int_to_ptr.vmem [resolvable:$true] %s30_s27 }
  0x15   :  { %p1947_p9 = scmp.lt.u32.totalorder %s1943_s30, %s2116_s2 }
  0x17   :  { %p1949_p10 = pnand %p1947_p9, %p1944_p8 }
  0x19   :  { %1952 = shalt.err (!%p1949_p10)
}
  0x1a   :  { %s1953_s8 = scalar_lea.vmem %s31_s27, 4096  ;;  %p1958_p12 = scmp.lt.s32.totalorder %s31_s27, %s31_s27 }
  0x1b   :  { %p1954_p11 = scmp.ne.s32.totalorder %s31_s27, %s1953_s8  ;;  %p1959_p13 = scmp.lt.s32.totalorder %s1953_s8, %s1953_s8 }
  0x1d   :  { %p1960_p0 = por %p1959_p13, %p1958_p12 }
  0x1f   :  { %p1961_p1 = pnand %p1960_p0, %p1954_p11 }
  0x21   :  { %1964 = shalt.err (!%p1961_p1)
}
  0x22   :  { %s1997_s1 = smov 64   ;;  %s1998_s9 = smov 4  }
  0x23   :  { %36 = dma.hbm_to_vmem [thread:$0]  %s2116_s2, 4096, %s31_s27, [#allocation6], %s1997_s1, %s1997_s1, %s1998_s9  }
  0x24   :  { %1987 = dma.done.wait [#allocation3], 15360  }
  0x25   :  { %1988 = vsyncadd [#allocation3], 4294951936 }
  0x26   :  { %1989 = dma.done.wait [#allocation6], 4096  }
  0x27   :  { %1990 = vsyncadd [#allocation6], 4294963200  ;;  %v1705_v0 = vld [vmem:[#allocation2 + $0x144] ss:$16 sps:$4 sm:$0xff]   ;;  %v1707_v1 = vld [vmem:[#allocation2 + $0x14c] ss:$16 sps:$4 sm:$0xff]  }
  0x28   :  { %369 = vmatprep.subr.bf16.mxu0 %v1705_v0  ;;  %v1709_v2 = vld [vmem:[#allocation2 + $0x140] ss:$16 sps:$4 sm:$0xff]   ;;  %v1710_v3 = vld [vmem:[#allocation2 + $0x148] ss:$16 sps:$4 sm:$0xff]   ;;  %412 = vmatprep.subr.bf16.mxu1 %v1707_v1  ;;  %v1711_v4 = vld [vmem:[#allocation2 + $0x164] ss:$16 sps:$4 sm:$0xff]  }
  0x29   :  { %370 = vmatpush1.bf16.msra.mxu0 %v1709_v2  ;;  %413 = vmatpush1.bf16.msra.mxu1 %v1710_v3  ;;  %v1713_v5 = vld [vmem:[#allocation2 + $0x16c] ss:$16 sps:$4 sm:$0xff]   ;;  %v1715_v6 = vld [vmem:[#allocation2 + $0x160] ss:$16 sps:$4 sm:$0xff]   ;;  %v1716_v7 = vld [vmem:[#allocation2 + $0x168] ss:$16 sps:$4 sm:$0xff]  }
  0x2a   :  { %371 = vmatprep.subr.bf16.mxu0 %v1711_v4  ;;  %414 = vmatprep.subr.bf16.mxu1 %v1713_v5  ;;  %v1717_v8 = vld [vmem:[#allocation2 + $0x184] ss:$16 sps:$4 sm:$0xff]   ;;  %v1719_v9 = vld [vmem:[#allocation2 + $0x18c] ss:$16 sps:$4 sm:$0xff]   ;;  %v1721_v10 = vld [vmem:[#allocation2 + $0x180] ss:$16 sps:$4 sm:$0xff]  }
  0x2b   :  { %v1722_v11 = vld [vmem:[#allocation2 + $0x188] ss:$16 sps:$4 sm:$0xff]   ;;  %v1723_v12 = vld [vmem:[#allocation2 + $0x1a4] ss:$16 sps:$4 sm:$0xff]   ;;  %v1725_v13 = vld [vmem:[#allocation2 + $0x1ac] ss:$16 sps:$4 sm:$0xff]  }
  0x2c   :  { %v1727_v14 = vld [vmem:[#allocation2 + $0x1a0] ss:$16 sps:$4 sm:$0xff]   ;;  %v1728_v15 = vld [vmem:[#allocation2 + $0x1a8] ss:$16 sps:$4 sm:$0xff]   ;;  %v1729_v16 = vld [vmem:[#allocation2 + $0x1c4] ss:$16 sps:$4 sm:$0xff]  }
  0x2d   :  { %372 = vmatpush1.bf16.msra.mxu0 %v1715_v6  ;;  %415 = vmatpush1.bf16.msra.mxu1 %v1716_v7  ;;  %v1731_v17 = vld [vmem:[#allocation2 + $0x1cc] ss:$16 sps:$4 sm:$0xff]   ;;  %v1733_v18 = vld [vmem:[#allocation2 + $0x1c0] ss:$16 sps:$4 sm:$0xff]   ;;  %v1734_v19 = vld [vmem:[#allocation2 + $0x1c8] ss:$16 sps:$4 sm:$0xff]  }
  0x2e   :  { %373 = vmatprep.subr.bf16.mxu0 %v1717_v8  ;;  %416 = vmatprep.subr.bf16.mxu1 %v1719_v9  ;;  %v1735_v20 = vld [vmem:[#allocation2 + $0x1e4] ss:$16 sps:$4 sm:$0xff]   ;;  %v1737_v21 = vld [vmem:[#allocation2 + $0x1ec] ss:$16 sps:$4 sm:$0xff]   ;;  %v1739_v22 = vld [vmem:[#allocation2 + $0x1e0] ss:$16 sps:$4 sm:$0xff]  }
  0x2f   :  { %v1740_v23 = vld [vmem:[#allocation2 + $0x1e8] ss:$16 sps:$4 sm:$0xff]   ;;  %v1741_v24 = vld [vmem:[#allocation2 + $0x204] ss:$16 sps:$4 sm:$0xff]   ;;  %v1743_v25 = vld [vmem:[#allocation2 + $0x20c] ss:$16 sps:$4 sm:$0xff]  }
  0x30   :  { %v1745_v26 = vld [vmem:[#allocation2 + $0x200] ss:$16 sps:$4 sm:$0xff]   ;;  %v1746_v27 = vld [vmem:[#allocation2 + $0x208] ss:$16 sps:$4 sm:$0xff]   ;;  %v1747_v28 = vld [vmem:[#allocation2 + $0x224] ss:$16 sps:$4 sm:$0xff]  }
  0x31   :  { %374 = vmatpush1.bf16.msra.mxu0 %v1721_v10  ;;  %417 = vmatpush1.bf16.msra.mxu1 %v1722_v11  ;;  %v1749_v29 = vld [vmem:[#allocation2 + $0x22c] ss:$16 sps:$4 sm:$0xff]   ;;  %v1751_v30 = vld [vmem:[#allocation2 + $0x220] ss:$16 sps:$4 sm:$0xff]   ;;  %v93_v33 = vld [vmem:[%s2114_s0 + $0x28] sm:$0x1] }
  0x32   :  { %375 = vmatprep.subr.bf16.mxu0 %v1723_v12  ;;  %418 = vmatprep.subr.bf16.mxu1 %v1725_v13  ;;  %v2049_v31 = vld [vmem:[%s2114_s0 + $0x18] sm:$0xff]  ;;  %v91_v32 = vld [vmem:[%s2114_s0 + $0x8] sm:$0xfe]  ;;  %v1753_v35 = vld [vmem:[#allocation2 + $0x244] ss:$16 sps:$4 sm:$0xff]   ;;  %v97_v37 = vpack.c.bf16 %v93_v33, %v93_v33  ;;  %vm365_vm1 = vcmask 261120  }
  0x33   :  { %v1752_v34 = vld [vmem:[#allocation2 + $0x228] ss:$16 sps:$4 sm:$0xff]   ;;  %v95_v36 = vpack.c.bf16 %v2049_v31, %v91_v32  ;;  %v1755_v38 = vld [vmem:[#allocation2 + $0x24c] ss:$16 sps:$4 sm:$0xff]   ;;  %vm139_vm0 = vsmask.f32 7424 }
  0x34   :  { %v1757_v39 = vld [vmem:[#allocation2 + $0x240] ss:$16 sps:$4 sm:$0xff]   ;;  %v160_v42 = vshll.u32 %v97_v37, 16  ;;  %v1758_v46 = vld [vmem:[#allocation2 + $0x248] ss:$16 sps:$4 sm:$0xff]   ;;  %vm797_vm2 = vcmask 1046528  }
  0x35   :  { %376 = vmatpush1.bf16.msra.mxu0 %v1727_v14  ;;  %419 = vmatpush1.bf16.msra.mxu1 %v1728_v15  ;;  %v153_v40 = vshrl.u32 %v95_v36, 16  ;;  %v155_v41 = vshll.u32 %v95_v36, 16  ;;  %v2061_v43 = vld [vmem:[%s2114_s0 + $0x10] sm:$0xff]  ;;  %v90_v44 = vld [vmem:[%s2114_s0] sm:$0xfe] }
  0x36   :  { %377 = vmatprep.subr.bf16.mxu0 %v1729_v16  ;;  %420 = vmatprep.subr.bf16.mxu1 %v1731_v17  ;;  %v92_v45 = vld [vmem:[%s2114_s0 + $0x20] sm:$0x1]  ;;  %v162_v48 = vrot.slane %v160_v42, 1  ;;  %v94_v49 = vpack.c.bf16 %v2061_v43, %v90_v44  ;;  %v1759_v51 = vld [vmem:[#allocation2 + $0x264] ss:$16 sps:$4 sm:$0xff]  }
  0x37   :  { %v157_v47 = vrot.slane %v155_v41, 1  ;;  %v96_v50 = vpack.c.bf16 %v92_v45, %v92_v45  ;;  %v1761_v52 = vld [vmem:[#allocation2 + $0x26c] ss:$16 sps:$4 sm:$0xff]   ;;  %v1763_v57 = vld [vmem:[#allocation2 + $0x260] ss:$16 sps:$4 sm:$0xff]  }
  0x38   :  { %v141_v54 = vshrl.u32 %v94_v49, 16  ;;  %v143_v55 = vshll.u32 %v94_v49, 16  ;;  %v1764_v58 = vld [vmem:[#allocation2 + $0x268] ss:$16 sps:$4 sm:$0xff]   ;;  %v1767_v60 = vld [vmem:[#allocation2 + $0x4] ss:$16 sps:$4 sm:$0xff]  }
  0x39   :  { %378 = vmatpush1.bf16.msra.mxu0 %v1733_v18  ;;  %421 = vmatpush1.bf16.msra.mxu1 %v1734_v19  ;;  %v158_v53 = vor.u32 %v157_v47, %v153_v40  ;;  %v148_v56 = vshll.u32 %v96_v50, 16  ;;  %v1770_v63 = vld [vmem:[#allocation2 + $0xc] ss:$16 sps:$4 sm:$0xff]   ;;  %v1765_v1 = vld [vmem:[#allocation2] ss:$16 sps:$4 sm:$0xff]  }
  0x3a   :  { %379 = vmatprep.subr.bf16.mxu0 %v1735_v20  ;;  %422 = vmatprep.subr.bf16.mxu1 %v1737_v21  ;;  %v145_v61 = vrot.slane %v143_v55, 1  ;;  %v1768_v2 = vld [vmem:[#allocation2 + $0x8] ss:$16 sps:$4 sm:$0xff]   ;;  %v1773_v4 = vld [vmem:[#allocation2 + $0x24] ss:$16 sps:$4 sm:$0xff]  }
  0x3b   :  { %v163_v59 = vsel %vm139_vm0, %v158_v53, %v162_v48  ;;  %v150_v62 = vrot.slane %v148_v56, 1  ;;  %v1776_v5 = vld [vmem:[#allocation2 + $0x2c] ss:$16 sps:$4 sm:$0xff]   ;;  %v1771_v6 = vld [vmem:[#allocation2 + $0x20] ss:$16 sps:$4 sm:$0xff]  }
  0x3c   :  { %1518 = vmatprep.mubr.msk.bf16.mxu0 %vm365_vm1, %v163_v59  ;;  %1519 = vmatprep.mubr.msk.bf16.mxu1 %vm365_vm1, %v163_v59  ;;  %v146_v0 = vor.u32 %v145_v61, %v141_v54  ;;  %v1774_v7 = vld [vmem:[#allocation2 + $0x28] ss:$16 sps:$4 sm:$0xff]   ;;  %v1779_v8 = vld [vmem:[#allocation2 + $0x44] ss:$16 sps:$4 sm:$0xff]   ;;  %v1782_v9 = vld [vmem:[#allocation2 + $0x4c] ss:$16 sps:$4 sm:$0xff]  }
  0x3d   :  { %380 = vmatpush1.bf16.msra.mxu0 %v1739_v22  ;;  %423 = vmatpush1.bf16.msra.mxu1 %v1740_v23  ;;  %v1777_v10 = vld [vmem:[#allocation2 + $0x40] ss:$16 sps:$4 sm:$0xff]   ;;  %v1780_v11 = vld [vmem:[#allocation2 + $0x48] ss:$16 sps:$4 sm:$0xff]   ;;  %v1785_v12 = vld [vmem:[#allocation2 + $0x64] ss:$16 sps:$4 sm:$0xff]  }
  0x3e   :  { %381 = vmatprep.subr.bf16.mxu0 %v1741_v24  ;;  %424 = vmatprep.subr.bf16.mxu1 %v1743_v25  ;;  %v151_v3 = vsel %vm139_vm0, %v146_v0, %v150_v62  ;;  %v1788_v13 = vld [vmem:[#allocation2 + $0x6c] ss:$16 sps:$4 sm:$0xff]   ;;  %v1783_v14 = vld [vmem:[#allocation2 + $0x60] ss:$16 sps:$4 sm:$0xff]   ;;  %v1786_v15 = vld [vmem:[#allocation2 + $0x68] ss:$16 sps:$4 sm:$0xff]  }
  0x3f   :  { %v1791_v16 = vld [vmem:[#allocation2 + $0x84] ss:$16 sps:$4 sm:$0xff]   ;;  %v1794_v17 = vld [vmem:[#allocation2 + $0x8c] ss:$16 sps:$4 sm:$0xff]   ;;  %v1789_v18 = vld [vmem:[#allocation2 + $0x80] ss:$16 sps:$4 sm:$0xff]  }
  0x40   :  { %v1792_v19 = vld [vmem:[#allocation2 + $0x88] ss:$16 sps:$4 sm:$0xff]   ;;  %v1797_v21 = vld [vmem:[#allocation2 + $0xa4] ss:$16 sps:$4 sm:$0xff]   ;;  %v1800_v22 = vld [vmem:[#allocation2 + $0xac] ss:$16 sps:$4 sm:$0xff]  }
  0x41   :  { %382 = vmatpush1.bf16.msra.mxu0 %v1745_v26  ;;  %425 = vmatpush1.bf16.msra.mxu1 %v1746_v27  ;;  %v45_v20 = vld [vmem:[%s2114_s0 + $0x8] sm:$0xff]  ;;  %v1795_v24 = vld [vmem:[#allocation2 + $0xa0] ss:$16 sps:$4 sm:$0xff]   ;;  %v1803_v26 = vld [vmem:[#allocation2 + $0xc4] ss:$16 sps:$4 sm:$0xff]  }
  0x42   :  { %383 = vmatprep.subr.bf16.mxu0 %v1747_v28  ;;  %426 = vmatprep.subr.bf16.mxu1 %v1749_v29  ;;  %v49_v23 = vpack.c.bf16 %v2049_v31, %v45_v20  ;;  %v1798_v25 = vld [vmem:[#allocation2 + $0xa8] ss:$16 sps:$4 sm:$0xff]   ;;  %v1806_v27 = vld [vmem:[#allocation2 + $0xcc] ss:$16 sps:$4 sm:$0xff]   ;;  %v1801_v28 = vld [vmem:[#allocation2 + $0xc0] ss:$16 sps:$4 sm:$0xff]  }
  0x43   :  { %v1804_v29 = vld [vmem:[#allocation2 + $0xc8] ss:$16 sps:$4 sm:$0xff]   ;;  %v1812_v32 = vld [vmem:[#allocation2 + $0xec] ss:$16 sps:$4 sm:$0xff]   ;;  %v1807_v33 = vld [vmem:[#allocation2 + $0xe0] ss:$16 sps:$4 sm:$0xff]  }
  0x44   :  { %v1818_v36 = vld [vmem:[#allocation2 + $0x10c] ss:$16 sps:$4 sm:$0xff]   ;;  %v1813_v37 = vld [vmem:[#allocation2 + $0x100] ss:$16 sps:$4 sm:$0xff]   ;;  %v1822_v42 = vld [vmem:[#allocation2 + $0x128] ss:$16 sps:$4 sm:$0xff]  }
  0x45   :  { %384 = vmatpush1.bf16.msra.mxu0 %v1751_v30  ;;  %427 = vmatpush1.bf16.msra.mxu1 %v1752_v34  ;;  %v1809_v30 = vld [vmem:[#allocation2 + $0xe4] ss:$16 sps:$4 sm:$0xff]   ;;  %v1810_v34 = vld [vmem:[#allocation2 + $0xe8] ss:$16 sps:$4 sm:$0xff]   ;;  %v1824_v40 = vld [vmem:[#allocation2 + $0x12c] ss:$16 sps:$4 sm:$0xff]  }
  0x46   :  { %385 = vmatprep.subr.bf16.mxu0 %v1753_v35  ;;  %428 = vmatprep.subr.bf16.mxu1 %v1755_v38  ;;  %v1815_v35 = vld [vmem:[#allocation2 + $0x104] ss:$16 sps:$4 sm:$0xff]   ;;  %v1816_v38 = vld [vmem:[#allocation2 + $0x108] ss:$16 sps:$4 sm:$0xff]   ;;  %v1819_v41 = vld [vmem:[#allocation2 + $0x120] ss:$16 sps:$4 sm:$0xff]  }
  0x47   :  { %v44_v44 = vld [vmem:[%s2114_s0] sm:$0xff]  ;;  %v1828_v49 = vld [vmem:[#allocation2 + $0x288] ss:$16 sps:$4 sm:$0xff]   ;;  %v1842_v59 = vld [vmem:[#allocation2 + $0x2cc] ss:$16 sps:$4 sm:$0xff]  }
  0x48   :  { %v1827_v45 = vld [vmem:[#allocation2 + $0x284] ss:$16 sps:$4 sm:$0xff]   ;;  %v48_v47 = vpack.c.bf16 %v2061_v43, %v44_v44  ;;  %v1825_v48 = vld [vmem:[#allocation2 + $0x280] ss:$16 sps:$4 sm:$0xff]   ;;  %v745_v53 = vld [vmem:[%s2114_s0 + $0x8] sm:$0xfc] }
  0x49   :  { %386 = vmatpush1.bf16.msra.mxu0 %v1757_v39  ;;  %429 = vmatpush1.bf16.msra.mxu1 %v1758_v46  ;;  %v1821_v39 = vld [vmem:[#allocation2 + $0x124] ss:$16 sps:$4 sm:$0xff]   ;;  %v1830_v46 = vld [vmem:[#allocation2 + $0x28c] ss:$16 sps:$4 sm:$0xff]   ;;  %v747_v54 = vld [vmem:[%s2114_s0 + $0x28] sm:$0x3] }
  0x4a   :  { %387 = vmatprep.subr.bf16.mxu0 %v1759_v51  ;;  %430 = vmatprep.subr.bf16.mxu1 %v1761_v52  ;;  %v1833_v50 = vld [vmem:[#allocation2 + $0x2a4] ss:$16 sps:$4 sm:$0xff]   ;;  %v1836_v51 = vld [vmem:[#allocation2 + $0x2ac] ss:$16 sps:$4 sm:$0xff]   ;;  %v1831_v52 = vld [vmem:[#allocation2 + $0x2a0] ss:$16 sps:$4 sm:$0xff]  }
  0x4b   :  { %v1834_v55 = vld [vmem:[#allocation2 + $0x2a8] ss:$16 sps:$4 sm:$0xff]   ;;  %v1839_v56 = vld [vmem:[#allocation2 + $0x2c4] ss:$16 sps:$4 sm:$0xff]  }
  0x4c   :  { %v1845_v0 = vld [vmem:[#allocation2 + $0x2e4] ss:$16 sps:$4 sm:$0xff]  }
  0x4d   :  { %388 = vmatpush1.bf16.msra.mxu0 %v1763_v57  ;;  %431 = vmatpush1.bf16.msra.mxu1 %v1764_v58  ;;  %v749_v57 = vpack.c.bf16 %v2049_v31, %v745_v53  ;;  %v751_v58 = vpack.c.bf16 %v747_v54, %v747_v54  ;;  %v1846_v31 = vld [vmem:[#allocation2 + $0x2e8] ss:$16 sps:$4 sm:$0xff]   ;;  %v1875_v20 = vld [vmem:[#allocation2 + $0x384] ss:$16 sps:$4 sm:$0xff]  }
  0x4e   :  { %658 = vmatprep.subr.bf16.mxu0 %v1767_v60  ;;  %701 = vmatprep.subr.bf16.mxu1 %v1770_v63  ;;  %v1837_v60 = vld [vmem:[#allocation2 + $0x2c0] ss:$16 sps:$4 sm:$0xff]   ;;  %v1840_v63 = vld [vmem:[#allocation2 + $0x2c8] ss:$16 sps:$4 sm:$0xff]  }
  0x4f   :  { %v801_v61 = vrot.slane %v749_v57, 1  ;;  %v802_v62 = vrot.slane %v751_v58, 1  ;;  %v1893_v44 = vld [vmem:[#allocation5 + $0x50] sm:$0xff]   ;;  %v1902_v53 = vld [vmem:[#allocation5 + $0xe0] sm:$0xff]   ;;  %v1906_v57 = vld [vmem:[#allocation5 + $0xe8] sm:$0xff]  }
  0x50   :  { %402 = vmatmul.mubr.bf16.vlgmr.msra.gmra.mrb[0].mxu0 %v151_v3  ;;  %445 = vmatmul.mubr.bf16.vlgmr.msra.gmra.mrb[0].mxu1 %v151_v3  ;;  %v1843_v3 = vld [vmem:[#allocation2 + $0x2e0] ss:$16 sps:$4 sm:$0xff]   ;;  %v1907_v58 = vld [vmem:[#allocation5 + $0x28] sm:$0xff]  }
  0x51   :  { %659 = vmatpush1.bf16.msra.mxu0 %v1765_v1  ;;  %702 = vmatpush1.bf16.msra.mxu1 %v1768_v2  ;;  %v803_v1 = vsel %vm797_vm2, %v801_v61, %v802_v62  ;;  %v1848_v2 = vld [vmem:[#allocation2 + $0x2ec] ss:$16 sps:$4 sm:$0xff]   ;;  %v1903_v54 = vld [vmem:[#allocation5 + $0x20] sm:$0xff]   ;;  %v1910_v61 = vld [vmem:[#allocation5 + $0xf0] sm:$0xff]  }
  0x52   :  { %660 = vmatprep.subr.bf16.mxu0 %v1773_v4  ;;  %703 = vmatprep.subr.bf16.mxu1 %v1776_v5  ;;  %v1851_v4 = vld [vmem:[#allocation2 + $0x304] ss:$16 sps:$4 sm:$0xff]   ;;  %v1854_v5 = vld [vmem:[#allocation2 + $0x30c] ss:$16 sps:$4 sm:$0xff]  }
  0x53   :  { %1560 = vmatprep.mubr.msk.bf16.mxu0 %vm365_vm1, %v49_v23  ;;  %1561 = vmatprep.mubr.msk.bf16.mxu1 %vm365_vm1, %v49_v23  ;;  %v746_v23 = vld [vmem:[%s2114_s0 + $0x20] sm:$0x3] }
  0x54   :  { %v1911_v62 = vld [vmem:[#allocation5 + $0x30] sm:$0xff]  }
  0x55   :  { %661 = vmatpush1.bf16.msra.mxu0 %v1771_v6  ;;  %704 = vmatpush1.bf16.msra.mxu1 %v1774_v7  ;;  %v1849_v6 = vld [vmem:[#allocation2 + $0x300] ss:$16 sps:$4 sm:$0xff]   ;;  %v1852_v7 = vld [vmem:[#allocation2 + $0x308] ss:$16 sps:$4 sm:$0xff]  }
  0x56   :  { %662 = vmatprep.subr.bf16.mxu0 %v1779_v8  ;;  %705 = vmatprep.subr.bf16.mxu1 %v1782_v9  ;;  %v1857_v8 = vld [vmem:[#allocation2 + $0x324] ss:$16 sps:$4 sm:$0xff]   ;;  %v1860_v9 = vld [vmem:[#allocation2 + $0x32c] ss:$16 sps:$4 sm:$0xff]  }
  0x59   :  { %663 = vmatpush1.bf16.msra.mxu0 %v1777_v10  ;;  %706 = vmatpush1.bf16.msra.mxu1 %v1780_v11  ;;  %v1855_v10 = vld [vmem:[#allocation2 + $0x320] ss:$16 sps:$4 sm:$0xff]   ;;  %v1858_v11 = vld [vmem:[#allocation2 + $0x328] ss:$16 sps:$4 sm:$0xff]  }
  0x5a   :  { %664 = vmatprep.subr.bf16.mxu0 %v1785_v12  ;;  %707 = vmatprep.subr.bf16.mxu1 %v1788_v13  ;;  %v1863_v12 = vld [vmem:[#allocation2 + $0x344] ss:$16 sps:$4 sm:$0xff]   ;;  %v1866_v13 = vld [vmem:[#allocation2 + $0x34c] ss:$16 sps:$4 sm:$0xff]  }
  0x5d   :  { %665 = vmatpush1.bf16.msra.mxu0 %v1783_v14  ;;  %708 = vmatpush1.bf16.msra.mxu1 %v1786_v15  ;;  %v1861_v14 = vld [vmem:[#allocation2 + $0x340] ss:$16 sps:$4 sm:$0xff]   ;;  %v1864_v15 = vld [vmem:[#allocation2 + $0x348] ss:$16 sps:$4 sm:$0xff]  }
  0x5e   :  { %666 = vmatprep.subr.bf16.mxu0 %v1791_v16  ;;  %709 = vmatprep.subr.bf16.mxu1 %v1794_v17  ;;  %v1869_v16 = vld [vmem:[#allocation2 + $0x364] ss:$16 sps:$4 sm:$0xff]   ;;  %v1872_v17 = vld [vmem:[#allocation2 + $0x36c] ss:$16 sps:$4 sm:$0xff]  }
  0x61   :  { %667 = vmatpush1.bf16.msra.mxu0 %v1789_v18  ;;  %710 = vmatpush1.bf16.msra.mxu1 %v1792_v19  ;;  %v1867_v18 = vld [vmem:[#allocation2 + $0x360] ss:$16 sps:$4 sm:$0xff]   ;;  %v1870_v19 = vld [vmem:[#allocation2 + $0x368] ss:$16 sps:$4 sm:$0xff]  }
  0x62   :  { %668 = vmatprep.subr.bf16.mxu0 %v1797_v21  ;;  %711 = vmatprep.subr.bf16.mxu1 %v1800_v22  ;;  %v1878_v21 = vld [vmem:[#allocation2 + $0x38c] ss:$16 sps:$4 sm:$0xff]   ;;  %v744_v22 = vld [vmem:[%s2114_s0] sm:$0xfc]  ;;  %s1999_s0 = smov [#allocation7]  }
  0x63   :  { %s1465_s8 = sshll.u32 %s1999_s0, 4  ;;  %s1466_s8 = int_to_ptr.vmem [resolvable:$true] %s1465_s8 }
  0x64   :  { %s1965_s1 = scalar_lea.vmem %s1466_s8, 256  ;;  %p1970_p3 = scmp.lt.s32.totalorder %s1466_s8, %s1466_s8 }
  0x65   :  { %669 = vmatpush1.bf16.msra.mxu0 %v1795_v24  ;;  %712 = vmatpush1.bf16.msra.mxu1 %v1798_v25  ;;  %v1873_v24 = vld [vmem:[#allocation2 + $0x380] ss:$16 sps:$4 sm:$0xff]   ;;  %v1876_v25 = vld [vmem:[#allocation2 + $0x388] ss:$16 sps:$4 sm:$0xff]   ;;  %p1966_p2 = scmp.ne.s32.totalorder %s1466_s8, %s1965_s1  ;;  %p1971_p4 = scmp.lt.s32.totalorder %s1965_s1, %s1965_s1 }
  0x66   :  { %670 = vmatprep.subr.bf16.mxu0 %v1803_v26  ;;  %713 = vmatprep.subr.bf16.mxu1 %v1806_v27  ;;  %v1881_v26 = vld [vmem:[#allocation2 + $0x3a4] ss:$16 sps:$4 sm:$0xff]   ;;  %v1884_v27 = vld [vmem:[#allocation2 + $0x3ac] ss:$16 sps:$4 sm:$0xff]  }
  0x67   :  { %p1972_p5 = por %p1971_p4, %p1970_p3 }
  0x69   :  { %671 = vmatpush1.bf16.msra.mxu0 %v1801_v28  ;;  %714 = vmatpush1.bf16.msra.mxu1 %v1804_v29  ;;  %v748_v28 = vpack.c.bf16 %v2061_v43, %v744_v22  ;;  %v750_v29 = vpack.c.bf16 %v746_v23, %v746_v23  ;;  %v1889_v43 = vld [vmem:[#allocation5 + $0x48] sm:$0xff]   ;;  %p1973_p6 = pnand %p1972_p5, %p1966_p2 }
  0x6a   :  { %672 = vmatprep.subr.bf16.mxu0 %v1809_v30  ;;  %715 = vmatprep.subr.bf16.mxu1 %v1812_v32  ;;  %v1879_v30 = vld [vmem:[#allocation2 + $0x3a0] ss:$16 sps:$4 sm:$0xff]   ;;  %v1882_v32 = vld [vmem:[#allocation2 + $0x3a8] ss:$16 sps:$4 sm:$0xff]  }
  0x6d   :  { %673 = vmatpush1.bf16.msra.mxu0 %v1807_v33  ;;  %716 = vmatpush1.bf16.msra.mxu1 %v1810_v34  ;;  %v798_v33 = vrot.slane %v748_v28, 1  ;;  %v799_v34 = vrot.slane %v750_v29, 1 }
  0x6e   :  { %674 = vmatprep.subr.bf16.mxu0 %v1815_v35  ;;  %717 = vmatprep.subr.bf16.mxu1 %v1818_v36  ;;  %v1885_v35 = vld [vmem:[#allocation5 + $0x40] sm:$0xff]  }
  0x6f   :  { %v1886_v36 = vld [vmem:[#allocation5 + $0xc0] sm:$0xff]  }
  0x71   :  { %675 = vmatpush1.bf16.msra.mxu0 %v1813_v37  ;;  %718 = vmatpush1.bf16.msra.mxu1 %v1816_v38  ;;  %v800_v37 = vsel %vm797_vm2, %v798_v33, %v799_v34  ;;  %v1887_v38 = vld [vmem:[#allocation5] sm:$0xff]  }
  0x72   :  { %676 = vmatprep.subr.bf16.mxu0 %v1821_v39  ;;  %719 = vmatprep.subr.bf16.mxu1 %v1824_v40  ;;  %v1888_v39 = vld [vmem:[#allocation5 + $0x80] sm:$0xff]   ;;  %v1890_v40 = vld [vmem:[#allocation5 + $0xc8] sm:$0xff]  }
  0x75   :  { %677 = vmatpush1.bf16.msra.mxu0 %v1819_v41  ;;  %720 = vmatpush1.bf16.msra.mxu1 %v1822_v42  ;;  %v1891_v41 = vld [vmem:[#allocation5 + $0x8] sm:$0xff]  }
  0x76   :  { %1008 = vmatprep.subr.bf16.mxu0 %v1827_v45  ;;  %1051 = vmatprep.subr.bf16.mxu1 %v1830_v46  ;;  %v1892_v42 = vld [vmem:[#allocation5 + $0x88] sm:$0xff]   ;;  %v1894_v45 = vld [vmem:[#allocation5 + $0xd0] sm:$0xff]  }
  0x77   :  { %v1895_v46 = vld [vmem:[#allocation5 + $0x10] sm:$0xff]  }
  0x78   :  { %691 = vmatmul.mubr.bf16.vlgmr.msra.gmra.mrb[0].mxu0 %v48_v47  ;;  %734 = vmatmul.mubr.bf16.vlgmr.msra.gmra.mrb[0].mxu1 %v48_v47  ;;  %v1896_v47 = vld [vmem:[#allocation5 + $0x90] sm:$0xff]  }
  0x79   :  { %1009 = vmatpush1.bf16.msra.mxu0 %v1825_v48  ;;  %1052 = vmatpush1.bf16.msra.mxu1 %v1828_v49  ;;  %v1897_v48 = vld [vmem:[#allocation5 + $0x58] sm:$0xff]  }
  0x7a   :  { %1010 = vmatprep.subr.bf16.mxu0 %v1833_v50  ;;  %1053 = vmatprep.subr.bf16.mxu1 %v1836_v51  ;;  %v1898_v49 = vld [vmem:[#allocation5 + $0xd8] sm:$0xff]  }
  0x7b   :  { %1602 = vmatprep.mubr.msk.bf16.mxu0 %vm365_vm1, %v803_v1  ;;  %1603 = vmatprep.mubr.msk.bf16.mxu1 %vm365_vm1, %v803_v1  ;;  %v1899_v50 = vld [vmem:[#allocation5 + $0x18] sm:$0xff]  }
  0x7c   :  { %v1900_v51 = vld [vmem:[#allocation5 + $0x98] sm:$0xff]  }
  0x7d   :  { %1011 = vmatpush1.bf16.msra.mxu0 %v1831_v52  ;;  %1054 = vmatpush1.bf16.msra.mxu1 %v1834_v55  ;;  %v1901_v52 = vld [vmem:[#allocation5 + $0x60] sm:$0xff]   ;;  %v1914_v1 = vld [vmem:[#allocation5 + $0xf8] sm:$0xff]  }
  0x7e   :  { %1012 = vmatprep.subr.bf16.mxu0 %v1839_v56  ;;  %1055 = vmatprep.subr.bf16.mxu1 %v1842_v59  ;;  %v1904_v55 = vld [vmem:[#allocation5 + $0xa0] sm:$0xff]   ;;  %v1905_v56 = vld [vmem:[#allocation5 + $0x68] sm:$0xff]  }
  0x7f   :  { %v1908_v59 = vld [vmem:[#allocation5 + $0xa8] sm:$0xff]  }
  0x81   :  { %1013 = vmatpush1.bf16.msra.mxu0 %v1837_v60  ;;  %1056 = vmatpush1.bf16.msra.mxu1 %v1840_v63  ;;  %v1909_v60 = vld [vmem:[#allocation5 + $0x70] sm:$0xff]  }
  0x82   :  { %1014 = vmatprep.subr.bf16.mxu0 %v1845_v0  ;;  %1057 = vmatprep.subr.bf16.mxu1 %v1848_v2  ;;  %v1912_v63 = vld [vmem:[#allocation5 + $0xb0] sm:$0xff]   ;;  %v1913_v0 = vld [vmem:[#allocation5 + $0x78] sm:$0xff]  }
  0x83   :  { %v1915_v2 = vld [vmem:[#allocation5 + $0x38] sm:$0xff]  }
  0x85   :  { %1015 = vmatpush1.bf16.msra.mxu0 %v1843_v3  ;;  %1058 = vmatpush1.bf16.msra.mxu1 %v1846_v31  ;;  %v1916_v3 = vld [vmem:[#allocation5 + $0xb8] sm:$0xff]  }
  0x86   :  { %1016 = vmatprep.subr.bf16.mxu0 %v1851_v4  ;;  %1059 = vmatprep.subr.bf16.mxu1 %v1854_v5 }
  0x89   :  { %1017 = vmatpush1.bf16.msra.mxu0 %v1849_v6  ;;  %1060 = vmatpush1.bf16.msra.mxu1 %v1852_v7 }
  0x8a   :  { %1018 = vmatprep.subr.bf16.mxu0 %v1857_v8  ;;  %1061 = vmatprep.subr.bf16.mxu1 %v1860_v9 }
  0x8d   :  { %1019 = vmatpush1.bf16.msra.mxu0 %v1855_v10  ;;  %1062 = vmatpush1.bf16.msra.mxu1 %v1858_v11 }
  0x8e   :  { %1020 = vmatprep.subr.bf16.mxu0 %v1863_v12  ;;  %1063 = vmatprep.subr.bf16.mxu1 %v1866_v13 }
  0x91   :  { %1021 = vmatpush1.bf16.msra.mxu0 %v1861_v14  ;;  %1064 = vmatpush1.bf16.msra.mxu1 %v1864_v15 }
  0x92   :  { %1022 = vmatprep.subr.bf16.mxu0 %v1869_v16  ;;  %1065 = vmatprep.subr.bf16.mxu1 %v1872_v17 }
  0x95   :  { %1023 = vmatpush1.bf16.msra.mxu0 %v1867_v18  ;;  %1066 = vmatpush1.bf16.msra.mxu1 %v1870_v19 }
  0x96   :  { %1024 = vmatprep.subr.bf16.mxu0 %v1875_v20  ;;  %1067 = vmatprep.subr.bf16.mxu1 %v1878_v21 }
  0x99   :  { %1025 = vmatpush1.bf16.msra.mxu0 %v1873_v24  ;;  %1068 = vmatpush1.bf16.msra.mxu1 %v1876_v25 }
  0x9a   :  { %1026 = vmatprep.subr.bf16.mxu0 %v1881_v26  ;;  %1069 = vmatprep.subr.bf16.mxu1 %v1884_v27 }
  0x9d   :  { %1027 = vmatpush1.bf16.msra.mxu0 %v1879_v30  ;;  %1070 = vmatpush1.bf16.msra.mxu1 %v1882_v32 }
  0x9e   :  { %1636 = vmatprep.subr.bf16.mxu0 %v1885_v35  ;;  %1658 = vmatprep.subr.bf16.mxu1 %v1886_v36 }
  0xa0   :  { %1041 = vmatmul.mubr.bf16.vlgmr.msra.gmra.mrb[0].mxu0 %v800_v37  ;;  %1084 = vmatmul.mubr.bf16.vlgmr.msra.gmra.mrb[0].mxu1 %v800_v37 }
  0xa1   :  { %1637 = vmatpush3.bf16.msra.mxu0 %v1887_v38  ;;  %1659 = vmatpush3.bf16.msra.mxu1 %v1888_v39 }
  0xa2   :  { %1638 = vmatprep.subr.bf16.mxu0 %v1889_v43  ;;  %1660 = vmatprep.subr.bf16.mxu1 %v1890_v40 }
  0xa5   :  { %1639 = vmatpush3.bf16.msra.mxu0 %v1891_v41  ;;  %1661 = vmatpush3.bf16.msra.mxu1 %v1892_v42 }
  0xa6   :  { %1640 = vmatprep.subr.bf16.mxu0 %v1893_v44  ;;  %1662 = vmatprep.subr.bf16.mxu1 %v1894_v45 }
  0xa9   :  { %1641 = vmatpush3.bf16.msra.mxu0 %v1895_v46  ;;  %1663 = vmatpush3.bf16.msra.mxu1 %v1896_v47 }
  0xaa   :  { %1642 = vmatprep.subr.bf16.mxu0 %v1897_v48  ;;  %1664 = vmatprep.subr.bf16.mxu1 %v1898_v49 }
  0xad   :  { %1643 = vmatpush3.bf16.msra.mxu0 %v1899_v50  ;;  %1665 = vmatpush3.bf16.msra.mxu1 %v1900_v51 }
  0xae   :  { %1644 = vmatprep.subr.bf16.mxu0 %v1901_v52  ;;  %1666 = vmatprep.subr.bf16.mxu1 %v1902_v53 }
  0xb1   :  { %1645 = vmatpush3.bf16.msra.mxu0 %v1903_v54  ;;  %1667 = vmatpush3.bf16.msra.mxu1 %v1904_v55 }
  0xb2   :  { %1646 = vmatprep.subr.bf16.mxu0 %v1905_v56  ;;  %1668 = vmatprep.subr.bf16.mxu1 %v1906_v57 }
  0xb5   :  { %1647 = vmatpush3.bf16.msra.mxu0 %v1907_v58  ;;  %1669 = vmatpush3.bf16.msra.mxu1 %v1908_v59 }
  0xb6   :  { %1648 = vmatprep.subr.bf16.mxu0 %v1909_v60  ;;  %1670 = vmatprep.subr.bf16.mxu1 %v1910_v61 }
  0xb9   :  { %1649 = vmatpush3.bf16.msra.mxu0 %v1911_v62  ;;  %1671 = vmatpush3.bf16.msra.mxu1 %v1912_v63 }
  0xba   :  { %1650 = vmatprep.subr.bf16.mxu0 %v1913_v0  ;;  %1672 = vmatprep.subr.bf16.mxu1 %v1914_v1 }
  0xbd   :  { %1651 = vmatpush3.bf16.msra.mxu0 %v1915_v2  ;;  %1673 = vmatpush3.bf16.msra.mxu1 %v1916_v3 }
 0x173   :  { %v1042_v31 = vpop.f32.mrb[0].mxu0  ;;  %v1085_v4 = vpop.f32.mrb[0].mxu1 }
 0x174   :  { %v1044_v5 = vpop.f32.mrb[1].mxu0  ;;  %v1087_v6 = vpop.f32.mrb[1].mxu1  ;;  %v1102_v9 = vmul.f32 %v1042_v31, %v1042_v31  ;;  %v1104_v10 = vmul.f32 %v1085_v4, %v1085_v4 }
 0x175   :  { %v1046_v7 = vpop.f32.mrb[2].mxu0  ;;  %v1089_v8 = vpop.f32.mrb[2].mxu1  ;;  %v1103_v15 = vmul.f32 %v1044_v5, %v1044_v5  ;;  %v1105_v16 = vmul.f32 %v1087_v6, %v1087_v6 }
 0x176   :  { %v1106_v11 = vmul.f32 %v1046_v7, %v1046_v7  ;;  %v1108_v12 = vmul.f32 %v1089_v8, %v1089_v8  ;;  %v1048_v13 = vpop.f32.mrb[3].mxu0  ;;  %v1091_v14 = vpop.f32.mrb[3].mxu1 }
 0x177   :  { %v1107_v17 = vmul.f32 %v1048_v13, %v1048_v13  ;;  %v1109_v18 = vmul.f32 %v1091_v14, %v1091_v14 }
 0x178   :  { %v1110_v19 = vpack.c.bf16 %v1106_v11, %v1102_v9  ;;  %v1112_v20 = vpack.c.bf16 %v1108_v12, %v1104_v10 }
 0x179   :  { %v1111_v21 = vpack.c.bf16 %v1107_v17, %v1103_v15  ;;  %v1113_v22 = vpack.c.bf16 %v1109_v18, %v1105_v16 }
 0x17b   :  { %1402 = vmatprep.mubr.bf16.mxu0 %v1111_v21  ;;  %1443 = vmatprep.mubr.bf16.mxu1 %v1113_v22 }
 0x17c   :  { %1403 = vmatmul.mubr.bf16.vlgmr.msra.gmra.mrb[4].mxu0 %v1110_v19  ;;  %1444 = vmatmul.mubr.bf16.vlgmr.msra.gmra.mrb[4].mxu1 %v1112_v20 }
 0x24f   :  { %v1652_v23 = vpop.f32.mrb[4].mxu0  ;;  %v1674_v24 = vpop.f32.mrb[4].mxu1 }
 0x250   :  { %v1653_v25 = vpop.f32.mrb[5].mxu0  ;;  %v1675_v26 = vpop.f32.mrb[5].mxu1 }
 0x251   :  { %v1654_v27 = vadd.f32 %v1653_v25, %v1652_v23  ;;  %v1676_v28 = vadd.f32 %v1675_v26, %v1674_v24  ;;  %v1655_v29 = vpop.f32.mrb[6].mxu0  ;;  %v1677_v30 = vpop.f32.mrb[6].mxu1 }
 0x252   :  { %v1656_v32 = vpop.f32.mrb[7].mxu0  ;;  %v1678_v33 = vpop.f32.mrb[7].mxu1 }
 0x253   :  { %v1446_v34 = vadd.f32 %v1676_v28, %v1654_v27  ;;  %v1657_v35 = vadd.f32 %v1656_v32, %v1655_v29  ;;  %v1679_v36 = vadd.f32 %v1678_v33, %v1677_v30 }
 0x255   :  { %v1452_v37 = vmax.f32 %v1446_v34, 1e-09  ;;  %v1449_v38 = vadd.f32 %v1679_v36, %v1657_v35 }
 0x257   :  { %1917 = vlog2.f32 %v1452_v37  ;;  %v1453_v39 = vmax.f32 %v1449_v38, 1e-09 }
 0x259   :  { %1919 = vlog2.f32 %v1453_v39 }
 0x261   :  { %v1918_v43 = vpop.eup %1917 }
 0x262   :  { %v1455_v40 = vmul.f32 0.6931472, %v1918_v43 }
 0x263   :  { %v1920_v41 = vpop.eup %1919 }
 0x264   :  { %1458 = vst [vmem:[#allocation7] sm:$0xff] %v1455_v40  ;;  %v1457_v42 = vmul.f32 0.6931472, %v1920_v41 }
 0x266   :  { %1459 = vst [vmem:[#allocation7 + $0x8] sm:$0xff] %v1457_v42 }
 0x267   :  { %1976 = shalt.err (!%p1973_p6)
}
 0x268   :  { %s1977_s11 = scalar_lea.hbm %s2117_s3, 256 }
 0x269   :  { %p1978_p7 = scmp.ne.s32.totalorder %s2117_s3, %s1977_s11  ;;  %p1981_p8 = scmp.lt.u32.totalorder %s1977_s11, %s2117_s3 }
 0x26b   :  { %p1983_p9 = pnand %p1981_p8, %p1978_p7 }
 0x26d   :  { %1986 = shalt.err (!%p1983_p9)
}
 0x26e   :  { %s2000_s15 = smov 128   ;;  %s2001_s16 = smov 8  }
 0x26f   :  { %1471 = dma.vmem_to_hbm [thread:$0]  %s1466_s8, 256, %s2117_s3, [#allocation4], %s2000_s15, %s2000_s15, %s2001_s16  }
 0x270   :  { %1991 = dma.done.wait [#allocation4], 256  }
 0x271   :  { %1992 = vsyncadd [#allocation4], 4294967040 }
 0x272   :  { %1475 = vsyncpa [#allocation3], 1 }
 0x273   :  { %1476 = vsyncpa [#allocation6], 1 }
 0x274   :  { %1477 = vsyncpa [#allocation4], 1 }

</bundles_post_ra>
